<compile_context>
chip_gen: v7x
topology: tpu7x:2x2x1
jax: 0.10.0
libtpu: 0.0.40
codegen_flags: <defaults>
</compile_context>

<pallas_src>
import math
from functools import partial

import jax
import jax.numpy as jnp
from jax.experimental import pallas as pl
from jax.experimental.pallas import tpu as pltpu

_VMEM_LIMIT = 32 * 1024 * 1024   # explicit scoped-VMEM cap (ok on v5e/v6e/v7x)
_TILE_BYTES = 2 * 1024 * 1024    # ~2 MiB per stream per pipeline buffer
_FUSED_BYTES = 12 * 1024 * 1024  # use single-pass path if 4 inputs + output fit here


def _cdiv(a, b):
    return -(-a // b)


def _round_up(x, m):
    return _cdiv(x, m) * m


def _leaky(x):
    return jnp.where(x > 0.0, x, 0.01 * x)


# --------------------------------------------------------------------------- #
# Kernels
# --------------------------------------------------------------------------- #
def _fused_kernel(scal_ref, n_ref, p_ref, s_ref, d_ref, w_ref, b_ref, q_ref,
                  o_ref):
    """Single-pass path: scores + softmax + blend with inputs resident in VMEM.

    scal_ref: SMEM (2,) f32 = [1/N, pad_rows * (leaky_relu(b) . q)]
    n/p/s/d : (R, C) feature views;  w: (C, C);  b, q: (1, C) f32.
    """
    inv_n = scal_ref[0]
    corr = scal_ref[1]
    w = w_ref[...]
    b = b_ref[...]
    qv = q_ref[...]

    def score(x_ref):
        y = jnp.dot(x_ref[...], w, preferred_element_type=jnp.float32) + b
        y = _leaky(y)
        num = jnp.sum(jnp.sum(y * qv, axis=1, keepdims=True),
                      axis=0, keepdims=True)          # (1, 1) f32
        return (num - corr) * inv_n

    s0 = score(n_ref)
    s1 = score(p_ref)
    s2 = score(s_ref)
    s3 = score(d_ref)

    # 4-way softmax on (1,1) values (kept as vregs; exp goes to the EUP).
    m = jnp.maximum(jnp.maximum(s0, s1), jnp.maximum(s2, s3))
    e0 = jnp.exp(s0 - m)
    e1 = jnp.exp(s1 - m)
    e2 = jnp.exp(s2 - m)
    e3 = jnp.exp(s3 - m)
    inv_den = 1.0 / (e0 + e1 + e2 + e3)

    ones_row = jnp.ones_like(qv)                      # (1, C)
    w0 = (e0 * inv_den) * ones_row
    w1 = (e1 * inv_den) * ones_row
    w2 = (e2 * inv_den) * ones_row
    w3 = (e3 * inv_den) * ones_row

    out = (w0 * n_ref[...] + w1 * p_ref[...] + w2 * s_ref[...] + w3 * d_ref[...])
    o_ref[...] = out.astype(o_ref.dtype)


def _score_kernel(n_ref, p_ref, s_ref, d_ref, w_ref, b_ref,
                  cn_ref, cp_ref, cs_ref, cd_ref):
    """Phase 1: per-source column sums of leaky_relu(x @ W_c + b).

    Grid = (P parallel chunks, T reduction tiles).  Accumulators (1,1,C) stay
    resident across the reduction axis; no staging copy, no VMEM scratch.
    """
    @pl.when(pl.program_id(1) == 0)
    def _init():
        cn_ref[...] = jnp.zeros_like(cn_ref)
        cp_ref[...] = jnp.zeros_like(cp_ref)
        cs_ref[...] = jnp.zeros_like(cs_ref)
        cd_ref[...] = jnp.zeros_like(cd_ref)

    w = w_ref[...]
    b = b_ref[...]

    def colsum(x_ref):
        y = jnp.dot(x_ref[...], w, preferred_element_type=jnp.float32) + b
        y = _leaky(y)
        return jnp.sum(y, axis=0, keepdims=True)[None]   # (1, 1, C)

    cn_ref[...] += colsum(n_ref)
    cp_ref[...] += colsum(p_ref)
    cs_ref[...] += colsum(s_ref)
    cd_ref[...] += colsum(d_ref)


def _blend_kernel(wts_ref, n_ref, p_ref, s_ref, d_ref, o_ref):
    """Phase 2: out = w0*n + w1*poi + w2*s + w3*d with SMEM scalar weights."""
    out = (wts_ref[0] * n_ref[...] + wts_ref[1] * p_ref[...]
           + wts_ref[2] * s_ref[...] + wts_ref[3] * d_ref[...])
    o_ref[...] = out.astype(o_ref.dtype)


# --------------------------------------------------------------------------- #
# Wrapper
# --------------------------------------------------------------------------- #
@partial(jax.jit, static_argnames=("max_fused_bytes", "tile_rows", "score_chunks"))
def attention_fusion(n_f, poi_f, s_f, d_f, weight, bias, q, *,
                     max_fused_bytes=_FUSED_BYTES, tile_rows=None,
                     score_chunks=2):
    """AttentionFusionLayer forward.  weight: (E, E) Linear weight; bias, q: (E,)."""
    N, E = n_f.shape
    dtype = n_f.dtype
    itemsize = jnp.dtype(dtype).itemsize

    # ---- lane-dense working layout ------------------------------------------
    lane_dense = (E <= 128) and (128 % E == 0)
    g = 128 // E if lane_dense else 1            # original rows per working row
    C = 128 if lane_dense else E                 # working row width
    row_bytes = _round_up(C, 128) * itemsize     # VMEM bytes per working row

    wt = weight.T.astype(dtype)                  # (E, E)
    if lane_dense:
        w_c = jnp.kron(jnp.eye(g, dtype=dtype), wt)              # (128,128) block-diag
        b_row = jnp.tile(bias.astype(jnp.float32), g).reshape(1, C)
        q_row = jnp.tile(q.astype(jnp.float32), g).reshape(1, C)
    else:
        w_c = wt
        b_row = bias.astype(jnp.float32).reshape(1, C)
        q_row = q.astype(jnp.float32).reshape(1, C)

    # Each zero padding row contributes leaky_relu(bias).q to a score numerator.
    corr_per_row = jnp.dot(_leaky(bias.astype(jnp.float32)), q.astype(jnp.float32))

    def as_view(x, n_total):
        extra = n_total - N
        if extra:
            x = jnp.pad(x, ((0, extra), (0, 0)))      # zero rows (corrected below)
        return x.reshape(n_total // g, C)

    # ---- small/medium N: fused single-pass path ------------------------------
    n_fused = _round_up(max(N, 1), 8 * g)
    r_fused = n_fused // g
    if 5 * r_fused * row_bytes <= max_fused_bytes:
        views = tuple(as_view(x, n_fused) for x in (n_f, poi_f, s_f, d_f))
        pad = n_fused - N
        scal = jnp.stack([jnp.asarray(1.0 / N, jnp.float32),
                          (pad * corr_per_row).astype(jnp.float32)])

        full = pl.BlockSpec((r_fused, C), lambda i: (0, 0))
        res = lambda shape: pl.BlockSpec(shape, lambda i: (0, 0))
        out = pl.pallas_call(
            _fused_kernel,
            out_shape=jax.ShapeDtypeStruct((r_fused, C), dtype),
            grid_spec=pltpu.PrefetchScalarGridSpec(
                num_scalar_prefetch=0,
                grid=(1,),
                in_specs=[pl.BlockSpec(memory_space=pltpu.MemorySpace.SMEM),
                          full, full, full, full,
                          res((C, C)), res((1, C)), res((1, C))],
                out_specs=full),
            compiler_params=pltpu.CompilerParams(
                dimension_semantics=("arbitrary",),
                vmem_limit_bytes=_VMEM_LIMIT),
        )(scal, *views, w_c, b_row, q_row)
        return out.reshape(n_fused, E)[:N]

    # ---- large N: two streaming phases ---------------------------------------
    P = max(1, int(score_chunks))                 # leading parallel chunks (v7x: 2 TCs)
    if tile_rows is None:
        tb_target = max(8, (_TILE_BYTES // row_bytes) // 8 * 8)
    else:
        tb_target = max(8, (int(tile_rows) // 8) * 8)

    r_raw = _cdiv(N, g)
    t1 = max(1, _cdiv(r_raw, P * tb_target))
    tb = min(tb_target, _round_up(_cdiv(r_raw, P * t1), 8))
    r_pad = P * t1 * tb
    n_total = r_pad * g
    pad = n_total - N

    views = tuple(as_view(x, n_total) for x in (n_f, poi_f, s_f, d_f))

    # Phase 1: per-source column sums, grid (parallel chunks, reduction tiles).
    feat_spec = pl.BlockSpec((tb, C), lambda pi, ti: (pi * t1 + ti, 0))
    acc_spec = pl.BlockSpec((1, 1, C), lambda pi, ti: (pi, 0, 0))
    acc_shape = jax.ShapeDtypeStruct((P, 1, C), jnp.float32)

    cn, cp, cs_, cd = pl.pallas_call(
        _score_kernel,
        out_shape=(acc_shape,) * 4,
        grid_spec=pltpu.PrefetchScalarGridSpec(
            num_scalar_prefetch=0,
            grid=(P, t1),
            in_specs=[feat_spec, feat_spec, feat_spec, feat_spec,
                      pl.BlockSpec((C, C), lambda pi, ti: (0, 0)),
                      pl.BlockSpec((1, C), lambda pi, ti: (0, 0))],
            out_specs=(acc_spec,) * 4),
        compiler_params=pltpu.CompilerParams(
            dimension_semantics=("parallel", "arbitrary"),
            vmem_limit_bytes=_VMEM_LIMIT),
    )(*views, w_c, b_row)

    # Tiny glue on 4*C numbers: finish scores and softmax over 4 scalars.
    def score(acc):
        tot = jnp.sum(acc, axis=(0, 1))                           # (C,)
        return (jnp.dot(tot, q_row[0]) - pad * corr_per_row) / N

    scores = jnp.stack([score(cn), score(cp), score(cs_), score(cd)])
    wts = jax.nn.softmax(scores).astype(jnp.float32)              # (4,)

    # Phase 2: lane-dense weighted blend, fully parallel over tiles.
    blend_spec = pl.BlockSpec((tb, C), lambda i: (i, 0))
    out = pl.pallas_call(
        _blend_kernel,
        out_shape=jax.ShapeDtypeStruct((r_pad, C), dtype),
        grid_spec=pltpu.PrefetchScalarGridSpec(
            num_scalar_prefetch=0,
            grid=(P * t1,),
            in_specs=[pl.BlockSpec(memory_space=pltpu.MemorySpace.SMEM),
                      blend_spec, blend_spec, blend_spec, blend_spec],
            out_specs=blend_spec),
        compiler_params=pltpu.CompilerParams(
            dimension_semantics=("parallel",),
            vmem_limit_bytes=_VMEM_LIMIT),
    )(wts, *views)

    return out.reshape(n_total, E)[:N]


# --------------------------------------------------------------------------- #
# Reference + tests
# --------------------------------------------------------------------------- #
def _reference(n_f, poi_f, s_f, d_f, weight, bias, q):
    def score(x):
        y = jnp.dot(x, weight.T, precision=jax.lax.Precision.HIGHEST) + bias
        y = jnp.where(y > 0, y, 0.01 * y)
        return jnp.mean(jnp.sum(y * q, axis=1))

    s = jnp.stack([score(n_f), score(poi_f), score(s_f), score(d_f)])
    w = jax.nn.softmax(s)
    return w[0] * n_f + w[1] * poi_f + w[2] * s_f + w[3] * d_f


if __name__ == "__main__":
    base_key = jax.random.PRNGKey(0)

    def run_case(N, E, **kw):
        key = jax.random.fold_in(base_key, N * 1000 + E)
        kn, kp, ks, kd, kwt, kb, kq = jax.random.split(key, 7)
        n_f = jax.random.normal(kn, (N, E), jnp.float32)
        poi_f = jax.random.normal(kp, (N, E), jnp.float32)
        s_f = jax.random.normal(ks, (N, E), jnp.float32)
        d_f = jax.random.normal(kd, (N, E), jnp.float32)
        weight = jax.random.normal(kwt, (E, E), jnp.float32) / jnp.sqrt(E)
        bias = jax.random.normal(kb, (E,), jnp.float32) * 0.1
        q = jax.random.normal(kq, (E,), jnp.float32)

        out = attention_fusion(n_f, poi_f, s_f, d_f, weight, bias, q, **kw)
        out = jax.block_until_ready(out)
        ref = _reference(n_f, poi_f, s_f, d_f, weight, bias, q)

        assert out.shape == (N, E), (out.shape, N, E)
        assert out.dtype == n_f.dtype
        # Tolerance covers MXU f32 matmul rounding; algorithmic errors are >> this.
        assert jnp.allclose(out, ref, atol=2e-3, rtol=2e-3), (N, E, kw)

    run_case(16, 32)                                   # fused single-pass, lane-dense
    run_case(37, 32)                                   # fused path with row padding
    run_case(40, 64)                                   # fused path, E=64 (g=2 block-diag)
    run_case(137, 32, max_fused_bytes=0, tile_rows=8)  # two-phase: parallel chunks +
                                                       # multi-tile reduction + blend
    print("KERNEL_OK")
</pallas_src>

<mosaic_0001>
module attributes {stable_mosaic.version = 11 : i64} {
  func.func @_fused_kernel(%arg0: i32, %arg1: memref<2xf32, #tpu.memory_space<smem>>, %arg2: memref<8x128xf32, #tpu.memory_space<vmem>>, %arg3: memref<8x128xf32, #tpu.memory_space<vmem>>, %arg4: memref<8x128xf32, #tpu.memory_space<vmem>>, %arg5: memref<8x128xf32, #tpu.memory_space<vmem>>, %arg6: memref<128x128xf32, #tpu.memory_space<vmem>>, %arg7: memref<1x128xf32, #tpu.memory_space<vmem>>, %arg8: memref<1x128xf32, #tpu.memory_space<vmem>>, %arg9: memref<8x128xf32, #tpu.memory_space<vmem>>) attributes {dimension_semantics = [#tpu.dimension_semantics<arbitrary>], iteration_bounds = array<i64: 1>, scalar_prefetch = 0 : i64, scratch_operands = 0 : i64, tpu.core_type = #tpu.core_type<tc>, window_params = [{transform_indices = @transform_0, window_bounds = array<i64: 2>}, {pipeline_mode = #tpu.pipeline_mode<synchronous>, transform_indices = @transform_1, window_bounds = array<i64: 8, 128>}, {pipeline_mode = #tpu.pipeline_mode<synchronous>, transform_indices = @transform_2, window_bounds = array<i64: 8, 128>}, {pipeline_mode = #tpu.pipeline_mode<synchronous>, transform_indices = @transform_3, window_bounds = array<i64: 8, 128>}, {pipeline_mode = #tpu.pipeline_mode<synchronous>, transform_indices = @transform_4, window_bounds = array<i64: 8, 128>}, {pipeline_mode = #tpu.pipeline_mode<synchronous>, transform_indices = @transform_5, window_bounds = array<i64: 128, 128>}, {pipeline_mode = #tpu.pipeline_mode<synchronous>, transform_indices = @transform_6, window_bounds = array<i64: 1, 128>}, {pipeline_mode = #tpu.pipeline_mode<synchronous>, transform_indices = @transform_7, window_bounds = array<i64: 1, 128>}, {pipeline_mode = #tpu.pipeline_mode<synchronous>, transform_indices = @transform_8, window_bounds = array<i64: 8, 128>}]} {
    %c0 = arith.constant 0 : index
    %0 = memref.load %arg1[%c0] : memref<2xf32, #tpu.memory_space<smem>>
    %c1 = arith.constant 1 : index
    %1 = memref.load %arg1[%c1] : memref<2xf32, #tpu.memory_space<smem>>
    %c0_0 = arith.constant 0 : index
    %c0_1 = arith.constant 0 : index
    %2 = vector.load %arg6[%c0_0, %c0_1] : memref<128x128xf32, #tpu.memory_space<vmem>>, vector<128x128xf32>
    %c0_2 = arith.constant 0 : index
    %c0_3 = arith.constant 0 : index
    %3 = vector.load %arg7[%c0_2, %c0_3] : memref<1x128xf32, #tpu.memory_space<vmem>>, vector<1x128xf32>
    %c0_4 = arith.constant 0 : index
    %c0_5 = arith.constant 0 : index
    %4 = vector.load %arg8[%c0_4, %c0_5] : memref<1x128xf32, #tpu.memory_space<vmem>>, vector<1x128xf32>
    %c0_6 = arith.constant 0 : index
    %c0_7 = arith.constant 0 : index
    %5 = vector.load %arg2[%c0_6, %c0_7] : memref<8x128xf32, #tpu.memory_space<vmem>>, vector<8x128xf32>
    %cst = arith.constant dense<0.000000e+00> : vector<8x128xf32>
    %6 = tpu.matmul %5, %2, %cst {dimension_numbers = #tpu.dot_dimension_numbers<[1], [0], [0], [1], [0, 0, 1, 1], [], []>} : vector<8x128xf32>, vector<128x128xf32>, vector<8x128xf32> -> vector<8x128xf32>
    %7 = vector.broadcast %3 : vector<1x128xf32> to vector<8x128xf32>
    %8 = arith.addf %6, %7 : vector<8x128xf32>
    %cst_8 = arith.constant 0.000000e+00 : f32
    %9 = vector.broadcast %cst_8 : f32 to vector<8x128xf32>
    %10 = arith.cmpf ogt, %8, %9 : vector<8x128xf32>
    %cst_9 = arith.constant 0.00999999977 : f32
    %11 = vector.broadcast %cst_9 : f32 to vector<8x128xf32>
    %12 = arith.mulf %11, %8 : vector<8x128xf32>
    %13 = arith.select %10, %8, %12 : vector<8x128xi1>, vector<8x128xf32>
    %14 = vector.broadcast %4 : vector<1x128xf32> to vector<8x128xf32>
    %15 = arith.mulf %13, %14 : vector<8x128xf32>
    %cst_10 = arith.constant dense<0.000000e+00> : vector<8xf32>
    %16 = vector.multi_reduction <add>, %15, %cst_10 [1] : vector<8x128xf32> to vector<8xf32>
    %17 = vector.shape_cast %16 : vector<8xf32> to vector<8x1xf32>
    %cst_11 = arith.constant dense<0.000000e+00> : vector<1xf32>
    %18 = vector.multi_reduction <add>, %17, %cst_11 [0] : vector<8x1xf32> to vector<1xf32>
    %19 = vector.shape_cast %18 : vector<1xf32> to vector<1x1xf32>
    %20 = vector.broadcast %1 : f32 to vector<1x1xf32>
    %21 = arith.subf %19, %20 : vector<1x1xf32>
    %22 = vector.broadcast %0 : f32 to vector<1x1xf32>
    %23 = arith.mulf %21, %22 : vector<1x1xf32>
    %c0_12 = arith.constant 0 : index
    %c0_13 = arith.constant 0 : index
    %24 = vector.load %arg3[%c0_12, %c0_13] : memref<8x128xf32, #tpu.memory_space<vmem>>, vector<8x128xf32>
    %cst_14 = arith.constant dense<0.000000e+00> : vector<8x128xf32>
    %25 = tpu.matmul %24, %2, %cst_14 {dimension_numbers = #tpu.dot_dimension_numbers<[1], [0], [0], [1], [0, 0, 1, 1], [], []>} : vector<8x128xf32>, vector<128x128xf32>, vector<8x128xf32> -> vector<8x128xf32>
    %26 = vector.broadcast %3 : vector<1x128xf32> to vector<8x128xf32>
    %27 = arith.addf %25, %26 : vector<8x128xf32>
    %cst_15 = arith.constant 0.000000e+00 : f32
    %28 = vector.broadcast %cst_15 : f32 to vector<8x128xf32>
    %29 = arith.cmpf ogt, %27, %28 : vector<8x128xf32>
    %cst_16 = arith.constant 0.00999999977 : f32
    %30 = vector.broadcast %cst_16 : f32 to vector<8x128xf32>
    %31 = arith.mulf %30, %27 : vector<8x128xf32>
    %32 = arith.select %29, %27, %31 : vector<8x128xi1>, vector<8x128xf32>
    %33 = vector.broadcast %4 : vector<1x128xf32> to vector<8x128xf32>
    %34 = arith.mulf %32, %33 : vector<8x128xf32>
    %cst_17 = arith.constant dense<0.000000e+00> : vector<8xf32>
    %35 = vector.multi_reduction <add>, %34, %cst_17 [1] : vector<8x128xf32> to vector<8xf32>
    %36 = vector.shape_cast %35 : vector<8xf32> to vector<8x1xf32>
    %cst_18 = arith.constant dense<0.000000e+00> : vector<1xf32>
    %37 = vector.multi_reduction <add>, %36, %cst_18 [0] : vector<8x1xf32> to vector<1xf32>
    %38 = vector.shape_cast %37 : vector<1xf32> to vector<1x1xf32>
    %39 = vector.broadcast %1 : f32 to vector<1x1xf32>
    %40 = arith.subf %38, %39 : vector<1x1xf32>
    %41 = vector.broadcast %0 : f32 to vector<1x1xf32>
    %42 = arith.mulf %40, %41 : vector<1x1xf32>
    %c0_19 = arith.constant 0 : index
    %c0_20 = arith.constant 0 : index
    %43 = vector.load %arg4[%c0_19, %c0_20] : memref<8x128xf32, #tpu.memory_space<vmem>>, vector<8x128xf32>
    %cst_21 = arith.constant dense<0.000000e+00> : vector<8x128xf32>
    %44 = tpu.matmul %43, %2, %cst_21 {dimension_numbers = #tpu.dot_dimension_numbers<[1], [0], [0], [1], [0, 0, 1, 1], [], []>} : vector<8x128xf32>, vector<128x128xf32>, vector<8x128xf32> -> vector<8x128xf32>
    %45 = vector.broadcast %3 : vector<1x128xf32> to vector<8x128xf32>
    %46 = arith.addf %44, %45 : vector<8x128xf32>
    %cst_22 = arith.constant 0.000000e+00 : f32
    %47 = vector.broadcast %cst_22 : f32 to vector<8x128xf32>
    %48 = arith.cmpf ogt, %46, %47 : vector<8x128xf32>
    %cst_23 = arith.constant 0.00999999977 : f32
    %49 = vector.broadcast %cst_23 : f32 to vector<8x128xf32>
    %50 = arith.mulf %49, %46 : vector<8x128xf32>
    %51 = arith.select %48, %46, %50 : vector<8x128xi1>, vector<8x128xf32>
    %52 = vector.broadcast %4 : vector<1x128xf32> to vector<8x128xf32>
    %53 = arith.mulf %51, %52 : vector<8x128xf32>
    %cst_24 = arith.constant dense<0.000000e+00> : vector<8xf32>
    %54 = vector.multi_reduction <add>, %53, %cst_24 [1] : vector<8x128xf32> to vector<8xf32>
    %55 = vector.shape_cast %54 : vector<8xf32> to vector<8x1xf32>
    %cst_25 = arith.constant dense<0.000000e+00> : vector<1xf32>
    %56 = vector.multi_reduction <add>, %55, %cst_25 [0] : vector<8x1xf32> to vector<1xf32>
    %57 = vector.shape_cast %56 : vector<1xf32> to vector<1x1xf32>
    %58 = vector.broadcast %1 : f32 to vector<1x1xf32>
    %59 = arith.subf %57, %58 : vector<1x1xf32>
    %60 = vector.broadcast %0 : f32 to vector<1x1xf32>
    %61 = arith.mulf %59, %60 : vector<1x1xf32>
    %c0_26 = arith.constant 0 : index
    %c0_27 = arith.constant 0 : index
    %62 = vector.load %arg5[%c0_26, %c0_27] : memref<8x128xf32, #tpu.memory_space<vmem>>, vector<8x128xf32>
    %cst_28 = arith.constant dense<0.000000e+00> : vector<8x128xf32>
    %63 = tpu.matmul %62, %2, %cst_28 {dimension_numbers = #tpu.dot_dimension_numbers<[1], [0], [0], [1], [0, 0, 1, 1], [], []>} : vector<8x128xf32>, vector<128x128xf32>, vector<8x128xf32> -> vector<8x128xf32>
    %64 = vector.broadcast %3 : vector<1x128xf32> to vector<8x128xf32>
    %65 = arith.addf %63, %64 : vector<8x128xf32>
    %cst_29 = arith.constant 0.000000e+00 : f32
    %66 = vector.broadcast %cst_29 : f32 to vector<8x128xf32>
    %67 = arith.cmpf ogt, %65, %66 : vector<8x128xf32>
    %cst_30 = arith.constant 0.00999999977 : f32
    %68 = vector.broadcast %cst_30 : f32 to vector<8x128xf32>
    %69 = arith.mulf %68, %65 : vector<8x128xf32>
    %70 = arith.select %67, %65, %69 : vector<8x128xi1>, vector<8x128xf32>
    %71 = vector.broadcast %4 : vector<1x128xf32> to vector<8x128xf32>
    %72 = arith.mulf %70, %71 : vector<8x128xf32>
    %cst_31 = arith.constant dense<0.000000e+00> : vector<8xf32>
    %73 = vector.multi_reduction <add>, %72, %cst_31 [1] : vector<8x128xf32> to vector<8xf32>
    %74 = vector.shape_cast %73 : vector<8xf32> to vector<8x1xf32>
    %cst_32 = arith.constant dense<0.000000e+00> : vector<1xf32>
    %75 = vector.multi_reduction <add>, %74, %cst_32 [0] : vector<8x1xf32> to vector<1xf32>
    %76 = vector.shape_cast %75 : vector<1xf32> to vector<1x1xf32>
    %77 = vector.broadcast %1 : f32 to vector<1x1xf32>
    %78 = arith.subf %76, %77 : vector<1x1xf32>
    %79 = vector.broadcast %0 : f32 to vector<1x1xf32>
    %80 = arith.mulf %78, %79 : vector<1x1xf32>
    %81 = arith.maximumf %23, %42 : vector<1x1xf32>
    %82 = arith.maximumf %61, %80 : vector<1x1xf32>
    %83 = arith.maximumf %81, %82 : vector<1x1xf32>
    %84 = arith.subf %23, %83 : vector<1x1xf32>
    %85 = math.exp %84 : vector<1x1xf32>
    %86 = arith.subf %42, %83 : vector<1x1xf32>
    %87 = math.exp %86 : vector<1x1xf32>
    %88 = arith.subf %61, %83 : vector<1x1xf32>
    %89 = math.exp %88 : vector<1x1xf32>
    %90 = arith.subf %80, %83 : vector<1x1xf32>
    %91 = math.exp %90 : vector<1x1xf32>
    %92 = arith.addf %85, %87 : vector<1x1xf32>
    %93 = arith.addf %92, %89 : vector<1x1xf32>
    %94 = arith.addf %93, %91 : vector<1x1xf32>
    %cst_33 = arith.constant 1.000000e+00 : f32
    %95 = vector.broadcast %cst_33 : f32 to vector<1x1xf32>
    %96 = arith.divf %95, %94 : vector<1x1xf32>
    %cst_34 = arith.constant 1.000000e+00 : f32
    %97 = vector.broadcast %cst_34 : f32 to vector<1x128xf32>
    %98 = arith.mulf %85, %96 : vector<1x1xf32>
    %99 = vector.broadcast %98 : vector<1x1xf32> to vector<1x128xf32>
    %100 = arith.mulf %99, %97 : vector<1x128xf32>
    %101 = arith.mulf %87, %96 : vector<1x1xf32>
    %102 = vector.broadcast %101 : vector<1x1xf32> to vector<1x128xf32>
    %103 = arith.mulf %102, %97 : vector<1x128xf32>
    %104 = arith.mulf %89, %96 : vector<1x1xf32>
    %105 = vector.broadcast %104 : vector<1x1xf32> to vector<1x128xf32>
    %106 = arith.mulf %105, %97 : vector<1x128xf32>
    %107 = arith.mulf %91, %96 : vector<1x1xf32>
    %108 = vector.broadcast %107 : vector<1x1xf32> to vector<1x128xf32>
    %109 = arith.mulf %108, %97 : vector<1x128xf32>
    %c0_35 = arith.constant 0 : index
    %c0_36 = arith.constant 0 : index
    %110 = vector.load %arg2[%c0_35, %c0_36] : memref<8x128xf32, #tpu.memory_space<vmem>>, vector<8x128xf32>
    %111 = vector.broadcast %100 : vector<1x128xf32> to vector<8x128xf32>
    %112 = arith.mulf %111, %110 : vector<8x128xf32>
    %c0_37 = arith.constant 0 : index
    %c0_38 = arith.constant 0 : index
    %113 = vector.load %arg3[%c0_37, %c0_38] : memref<8x128xf32, #tpu.memory_space<vmem>>, vector<8x128xf32>
    %114 = vector.broadcast %103 : vector<1x128xf32> to vector<8x128xf32>
    %115 = arith.mulf %114, %113 : vector<8x128xf32>
    %116 = arith.addf %112, %115 : vector<8x128xf32>
    %c0_39 = arith.constant 0 : index
    %c0_40 = arith.constant 0 : index
    %117 = vector.load %arg4[%c0_39, %c0_40] : memref<8x128xf32, #tpu.memory_space<vmem>>, vector<8x128xf32>
    %118 = vector.broadcast %106 : vector<1x128xf32> to vector<8x128xf32>
    %119 = arith.mulf %118, %117 : vector<8x128xf32>
    %120 = arith.addf %116, %119 : vector<8x128xf32>
    %c0_41 = arith.constant 0 : index
    %c0_42 = arith.constant 0 : index
    %121 = vector.load %arg5[%c0_41, %c0_42] : memref<8x128xf32, #tpu.memory_space<vmem>>, vector<8x128xf32>
    %122 = vector.broadcast %109 : vector<1x128xf32> to vector<8x128xf32>
    %123 = arith.mulf %122, %121 : vector<8x128xf32>
    %124 = arith.addf %120, %123 : vector<8x128xf32>
    %c0_43 = arith.constant 0 : index
    %c0_44 = arith.constant 0 : index
    %125 = vector.load %arg9[%c0_43, %c0_44] : memref<8x128xf32, #tpu.memory_space<vmem>>, vector<8x128xf32>
    tpu.vector_store %arg9[%c0_43, %c0_44], %124 {strides = array<i32>} : memref<8x128xf32, #tpu.memory_space<vmem>>, vector<8x128xf32>,
    return
  }
  func.func @transform_0(%arg0: i32) -> i32 {
    %c0_i32 = arith.constant 0 : i32
    %c0_i32_0 = arith.constant 0 : i32
    return %c0_i32 : i32
  }
  func.func @transform_1(%arg0: i32) -> (i32, i32) {
    %c0_i32 = arith.constant 0 : i32
    %c0_i32_0 = arith.constant 0 : i32
    %c0_i32_1 = arith.constant 0 : i32
    return %c0_i32, %c0_i32_0 : i32, i32
  }
  func.func @transform_2(%arg0: i32) -> (i32, i32) {
    %c0_i32 = arith.constant 0 : i32
    %c0_i32_0 = arith.constant 0 : i32
    %c0_i32_1 = arith.constant 0 : i32
    return %c0_i32, %c0_i32_0 : i32, i32
  }
  func.func @transform_3(%arg0: i32) -> (i32, i32) {
    %c0_i32 = arith.constant 0 : i32
    %c0_i32_0 = arith.constant 0 : i32
    %c0_i32_1 = arith.constant 0 : i32
    return %c0_i32, %c0_i32_0 : i32, i32
  }
  func.func @transform_4(%arg0: i32) -> (i32, i32) {
    %c0_i32 = arith.constant 0 : i32
    %c0_i32_0 = arith.constant 0 : i32
    %c0_i32_1 = arith.constant 0 : i32
    return %c0_i32, %c0_i32_0 : i32, i32
  }
  func.func @transform_5(%arg0: i32) -> (i32, i32) {
    %c0_i32 = arith.constant 0 : i32
    %c0_i32_0 = arith.constant 0 : i32
    %c0_i32_1 = arith.constant 0 : i32
    return %c0_i32, %c0_i32_0 : i32, i32
  }
  func.func @transform_6(%arg0: i32) -> (i32, i32) {
    %c0_i32 = arith.constant 0 : i32
    %c0_i32_0 = arith.constant 0 : i32
    %c0_i32_1 = arith.constant 0 : i32
    return %c0_i32, %c0_i32_0 : i32, i32
  }
  func.func @transform_7(%arg0: i32) -> (i32, i32) {
    %c0_i32 = arith.constant 0 : i32
    %c0_i32_0 = arith.constant 0 : i32
    %c0_i32_1 = arith.constant 0 : i32
    return %c0_i32, %c0_i32_0 : i32, i32
  }
  func.func @transform_8(%arg0: i32) -> (i32, i32) {
    %c0_i32 = arith.constant 0 : i32
    %c0_i32_0 = arith.constant 0 : i32
    %c0_i32_1 = arith.constant 0 : i32
    return %c0_i32, %c0_i32_0 : i32, i32
  }
}

</mosaic_0001>

<bundles_post_ra>
// kernel: tile.13
= control target key start
LH: loop header
LB: loop body
LE: loop exit
PB: predicated region body
PF: predicated region fallthrough
CT: control target
= control target key end

     0   :  { %s22_s0 = inlined_call_operand.vmem [shape: f32[32], index: 0, kind: input, shape index: {}]   ;;  %s23_s1 = inlined_call_operand.vmem [shape: f32[4,32], index: 1, kind: output, shape index: {}]  }
   0x1   :  { %v4_v0 = vld [vmem:[%s22_s0] ss:$0 sm:$0xff] }
   0x2   :  { %5 = vst [vmem:[%s23_s1] sm:$0xf] %v4_v0 }

// kernel: tile.14
= control target key start
LH: loop header
LB: loop body
LE: loop exit
PB: predicated region body
PF: predicated region fallthrough
CT: control target
= control target key end

     0   :  { %vm7_vm0 = vcmask 261120   ;;  %s37_s8 = smov 32   ;;  %s38_s9 = smov 64   ;;  %vm13_vm1 = vcmask 1048320   ;;  %vm19_vm2 = vcmask 785920   ;;  %vm25_vm3 = vcmask 523520   ;;  %s55_s0 = inlined_call_operand.vmem [shape: f32[4,32], index: 0, kind: input, shape index: {}]   ;;  %s56_s1 = inlined_call_operand.vmem [shape: f32[1,128], index: 1, kind: output, shape index: {}]  }
   0x1   :  { %v4_v0 = vld [vmem:[%s55_s0] sm:$0xf]  ;;  %s36_s0 = smov 96  }
   0x2   :  { %5 = vst [vmem:[#allocation1] sm:$0xf] %v4_v0 }
   0x9   :  { %v10_v1 = vld [vmem:[#allocation1 + $0x3] sm:$0x1]   ;;  %v22_v2 = vld [vmem:[#allocation1 + $0x1] sm:$0x1]   ;;  %v6_v3 = vld [vmem:[#allocation1] sm:$0x1]  }
   0xa   :  { %11 = vrot.lane.b32.xlu0 %v10_v1, %s36_s0  ;;  %23 = vrot.lane.b32.xlu1 %v22_v2, %s37_s8  ;;  %v16_v4 = vld [vmem:[#allocation1 + $0x2] sm:$0x1]   ;;  %8 = vst.msk [vmem:[#allocation0] sm:$0x1] %vm7_vm0, %v6_v3  }
   0xe   :  { %17 = vrot.lane.b32.xlu0 %v16_v4, %s38_s9 }
  0x7c   :  { %v12_v5 = vpop.permute.xlu0 %11   ;;  %v24_v6 = vpop.permute.xlu1 %23  }
  0x7d   :  { %14 = vst.msk [vmem:[#allocation0] sm:$0x1] %vm13_vm1, %v12_v5  }
  0x80   :  { %v18_v7 = vpop.permute.xlu0 %17  }
  0x81   :  { %20 = vst.msk [vmem:[#allocation0] sm:$0x1] %vm19_vm2, %v18_v7  }
  0x82   :  { %26 = vst.msk [vmem:[#allocation0] sm:$0x1] %vm25_vm3, %v24_v6  }
  0x89   :  { %v30_v8 = vld [vmem:[#allocation0] sm:$0x1] }
  0x8a   :  { %32 = vst [vmem:[%s56_s1] sm:$0x1] %v30_v8 }

</bundles_post_ra>
